<compile_context>
chip_gen: v6e
topology: v6e:2x2x1
jax: 0.10.0
libtpu: 0.0.40
codegen_flags: <defaults>
</compile_context>

<pallas_src>
import functools

import jax
import jax.numpy as jnp
from jax.experimental import pallas as pl
from jax.experimental.pallas import tpu as pltpu


def _round_up(x, m):
    return ((x + m - 1) // m) * m


def _ffn_kernel(x_ref, w1_ref, b1_ref, w2_ref, b2_ref, gamma_ref, beta_ref,
                out_ref, *, eps, d_valid):
    """Fused 1x1-conv FFN + residual + LayerNorm on one row tile.

    x_ref   : (row_tile, Dp)  f32   flattened tokens, channel dim zero-padded
    w1_ref  : (Dp, Hp)        bf16  Conv1d(d_in->d_hid, 1) weight (transposed, padded)
    b1_ref  : (1, Hp)         f32
    w2_ref  : (Hp, Dp)        bf16  Conv1d(d_hid->d_in, 1) weight (transposed, padded)
    b2_ref  : (1, Dp)         f32
    gamma   : (1, Dp)         f32   (pad lanes zero)
    beta    : (1, Dp)         f32   (pad lanes zero)
    out_ref : (row_tile, Dp)  f32
    """
    x = x_ref[...]                                   # f32, kept for the residual

    # Both 1x1 convs as bf16 MXU matmuls with f32 accumulation.
    h = jnp.dot(x.astype(jnp.bfloat16), w1_ref[...],
                preferred_element_type=jnp.float32) + b1_ref[...]
    h = jnp.maximum(h, 0.0)
    y = jnp.dot(h.astype(jnp.bfloat16), w2_ref[...],
                preferred_element_type=jnp.float32) + b2_ref[...]

    # Residual add.  Pad lanes of x, the padded W2 output columns and b2 are all
    # exact zeros, so pad lanes of v are exactly zero and do not perturb the sums.
    v = y + x

    # One-pass mean / unbiased variance over the true d_valid channels.
    s1 = jnp.sum(v, axis=-1, keepdims=True)
    s2 = jnp.sum(v * v, axis=-1, keepdims=True)
    mean = s1 * (1.0 / d_valid)
    var = (s2 - d_valid * mean * mean) * (1.0 / (d_valid - 1))
    std = jnp.sqrt(jnp.maximum(var, 0.0))            # guard tiny negative rounding

    # torch-style LayerNorm: gamma * (v - mean) / (std + eps) + beta.
    inv = pl.reciprocal(std + eps, approx=True)      # EUP slot, off the VPU path
    out = gamma_ref[...] * ((v - mean) * inv) + beta_ref[...]
    out_ref[...] = out.astype(out_ref.dtype)


def positionwise_ffn_pallas(params, x, *, eps=1e-6, row_tile=None):
    """out = PositionwiseFeedForward.forward(x)  (eval mode).

    x : (B, L, d_in) float32  ->  (B, L, d_in) float32
    """
    B, L, d_in = x.shape
    d_hid = params["w1"].shape[1]
    N = B * L

    # ---- layout / tile-size selection --------------------------------------
    # Lane-dense channel dims (multiples of 128).  (256-multiples would suit the
    # v6e/v7x 2x256 MXU even better, but would over-pad tiny channel counts;
    # row_tile below is already 256-aligned for large N.)
    Dp = _round_up(d_in, 128)
    Hp = _round_up(d_hid, 128)

    if row_tile is None:
        # Cap at 512 rows (already ~85% of HBM roofline per measured Pallas data)
        # and guarantee >= 2 grid steps so the "parallel" axis shards across the
        # two v7x TensorCores.  Never the full slab -> no VMEM blow-up at large N.
        row_tile = 512 if N >= 1024 else max(8, _round_up(pl.cdiv(N, 2), 8))
    row_tile = max(8, _round_up(int(row_tile), 8))
    Np = _round_up(N, row_tile)            # pad rows instead of un-tiling
    grid = (Np // row_tile,)

    # ---- one-time operand prep (outside the kernel) -------------------------
    x2 = jnp.pad(x.reshape(N, d_in), ((0, Np - N), (0, Dp - d_in)))
    w1 = jnp.pad(params["w1"], ((0, Dp - d_in), (0, Hp - d_hid))).astype(jnp.bfloat16)
    b1 = jnp.pad(params["b1"], ((0, 0), (0, Hp - d_hid)))
    w2 = jnp.pad(params["w2"], ((0, Hp - d_hid), (0, Dp - d_in))).astype(jnp.bfloat16)
    b2 = jnp.pad(params["b2"], ((0, 0), (0, Dp - d_in)))
    gamma = jnp.pad(params["gamma"], ((0, 0), (0, Dp - d_in)))
    beta = jnp.pad(params["beta"], ((0, 0), (0, Dp - d_in)))

    # ---- VMEM budget / cost hint --------------------------------------------
    resident = 2 * Dp * Hp * 2 + (Hp + 3 * Dp) * 4        # bf16 weights + small vecs
    io = 2 * 2 * row_tile * Dp * 4                        # x + out, double-buffered
    interm = 2 * row_tile * Hp * 4                        # f32 h / y headroom
    vmem_limit = int(min(64 << 20, resident + io + interm + (4 << 20)))
    cost = pl.CostEstimate(
        flops=2 * 2 * Np * Dp * Hp,
        transcendentals=2 * Np,
        bytes_accessed=2 * Np * Dp * 4 + 2 * Dp * Hp * 2,
    )

    one_buf = pl.Buffered(1)               # constant-index operands: single buffer
    const2 = lambda i: (0, 0)

    out_p = pl.pallas_call(
        functools.partial(_ffn_kernel, eps=eps, d_valid=d_in),
        out_shape=jax.ShapeDtypeStruct((Np, Dp), x.dtype),
        grid_spec=pltpu.PrefetchScalarGridSpec(
            num_scalar_prefetch=0,
            grid=grid,
            in_specs=[
                # Token tile (bump to pl.Buffered(3) only if DMA is still exposed
                # after profiling -- costs VMEM headroom on v7x).
                pl.BlockSpec((row_tile, Dp), lambda i: (i, 0)),
                pl.BlockSpec((Dp, Hp), const2, pipeline_mode=one_buf),   # W1
                pl.BlockSpec((1, Hp), const2, pipeline_mode=one_buf),    # b1
                pl.BlockSpec((Hp, Dp), const2, pipeline_mode=one_buf),   # W2
                pl.BlockSpec((1, Dp), const2, pipeline_mode=one_buf),    # b2
                pl.BlockSpec((1, Dp), const2, pipeline_mode=one_buf),    # gamma
                pl.BlockSpec((1, Dp), const2, pipeline_mode=one_buf),    # beta
            ],
            out_specs=pl.BlockSpec((row_tile, Dp), lambda i: (i, 0)),
        ),
        compiler_params=pltpu.CompilerParams(
            dimension_semantics=("parallel",),     # row tiles are independent
            vmem_limit_bytes=vmem_limit,
        ),
        cost_estimate=cost,
    )(x2, w1, b1, w2, b2, gamma, beta)

    return out_p[:N, :d_in].reshape(B, L, d_in)


def _reference_forward(params, x, eps=1e-6):
    """Pure-JAX (f32) reference of the same eval-mode forward pass."""
    h = jnp.maximum(x @ params["w1"] + params["b1"][0], 0.0)
    y = h @ params["w2"] + params["b2"][0]
    v = y + x
    mean = jnp.mean(v, axis=-1, keepdims=True)
    std = jnp.std(v, axis=-1, keepdims=True, ddof=1)       # torch.std is unbiased
    return params["gamma"][0] * (v - mean) / (std + eps) + params["beta"][0]


def make_params(key, d_in, d_hid):
    k1, k2, k3, k4 = jax.random.split(key, 4)
    scale = 0.1
    return {
        # Conv1d(d_in, d_hid, 1).weight is (d_hid, d_in, 1); stored pre-transposed.
        "w1": scale * jax.random.normal(k1, (d_in, d_hid), jnp.float32),
        "b1": scale * jax.random.normal(k2, (1, d_hid), jnp.float32),
        "w2": scale * jax.random.normal(k3, (d_hid, d_in), jnp.float32),
        "b2": scale * jax.random.normal(k4, (1, d_in), jnp.float32),
        "gamma": jnp.ones((1, d_in), jnp.float32),
        "beta": jnp.zeros((1, d_in), jnp.float32),
    }


if __name__ == "__main__":
    # Small shapes consistent with the module: batch=2, seq=16, d_in=32, d_hid=64.
    B, L, D_IN, D_HID = 2, 16, 32, 64

    key = jax.random.PRNGKey(0)
    kx, kp = jax.random.split(key, 2)

    params = make_params(kp, D_IN, D_HID)
    x = jax.random.normal(kx, (B, L, D_IN), jnp.float32)

    out = positionwise_ffn_pallas(params, x)
    out = jax.block_until_ready(out)

    # Sanity checks: shape and agreement with pure-JAX f32 reference
    # (kernel uses bf16 MXU inputs + approx reciprocal -> slightly looser tol).
    assert out.shape == (B, L, D_IN), out.shape
    ref = jax.block_until_ready(_reference_forward(params, x))
    max_err = float(jnp.max(jnp.abs(out - ref)))
    assert jnp.allclose(out, ref, atol=2e-2, rtol=2e-2), max_err

    print("KERNEL_OK")
</pallas_src>

<mosaic_0001>
module attributes {stable_mosaic.version = 11 : i64} {
  func.func @_ffn_kernel(%arg0: i32, %arg1: memref<16x128xf32, #tpu.memory_space<vmem>>, %arg2: memref<128x128xbf16, #tpu.memory_space<vmem>>, %arg3: memref<1x128xf32, #tpu.memory_space<vmem>>, %arg4: memref<128x128xbf16, #tpu.memory_space<vmem>>, %arg5: memref<1x128xf32, #tpu.memory_space<vmem>>, %arg6: memref<1x128xf32, #tpu.memory_space<vmem>>, %arg7: memref<1x128xf32, #tpu.memory_space<vmem>>, %arg8: memref<16x128xf32, #tpu.memory_space<vmem>>) attributes {dimension_semantics = [#tpu.dimension_semantics<parallel>], iteration_bounds = array<i64: 2>, scalar_prefetch = 0 : i64, scratch_operands = 0 : i64, tpu.core_type = #tpu.core_type<tc>, window_params = [{transform_indices = @transform_0, window_bounds = array<i64: 16, 128>}, {pipeline_mode = #tpu.pipeline_mode<synchronous>, transform_indices = @transform_1, window_bounds = array<i64: 128, 128>}, {pipeline_mode = #tpu.pipeline_mode<synchronous>, transform_indices = @transform_2, window_bounds = array<i64: 1, 128>}, {pipeline_mode = #tpu.pipeline_mode<synchronous>, transform_indices = @transform_3, window_bounds = array<i64: 128, 128>}, {pipeline_mode = #tpu.pipeline_mode<synchronous>, transform_indices = @transform_4, window_bounds = array<i64: 1, 128>}, {pipeline_mode = #tpu.pipeline_mode<synchronous>, transform_indices = @transform_5, window_bounds = array<i64: 1, 128>}, {pipeline_mode = #tpu.pipeline_mode<synchronous>, transform_indices = @transform_6, window_bounds = array<i64: 1, 128>}, {transform_indices = @transform_7, window_bounds = array<i64: 16, 128>}]} {
    %c0 = arith.constant 0 : index
    %c0_0 = arith.constant 0 : index
    %0 = vector.load %arg1[%c0, %c0_0] : memref<16x128xf32, #tpu.memory_space<vmem>>, vector<16x128xf32>
    %1 = arith.truncf %0 : vector<16x128xf32> to vector<16x128xbf16>
    %c0_1 = arith.constant 0 : index
    %c0_2 = arith.constant 0 : index
    %2 = vector.load %arg2[%c0_1, %c0_2] : memref<128x128xbf16, #tpu.memory_space<vmem>>, vector<128x128xbf16>
    %cst = arith.constant dense<0.000000e+00> : vector<16x128xf32>
    %3 = tpu.matmul %1, %2, %cst {dimension_numbers = #tpu.dot_dimension_numbers<[1], [0], [0], [1], [0, 0, 1, 1], [], []>} : vector<16x128xbf16>, vector<128x128xbf16>, vector<16x128xf32> -> vector<16x128xf32>
    %c0_3 = arith.constant 0 : index
    %c0_4 = arith.constant 0 : index
    %4 = vector.load %arg3[%c0_3, %c0_4] : memref<1x128xf32, #tpu.memory_space<vmem>>, vector<1x128xf32>
    %5 = vector.broadcast %4 : vector<1x128xf32> to vector<16x128xf32>
    %6 = arith.addf %3, %5 : vector<16x128xf32>
    %cst_5 = arith.constant 0.000000e+00 : f32
    %7 = vector.broadcast %cst_5 : f32 to vector<16x128xf32>
    %8 = arith.maximumf %6, %7 : vector<16x128xf32>
    %9 = arith.truncf %8 : vector<16x128xf32> to vector<16x128xbf16>
    %c0_6 = arith.constant 0 : index
    %c0_7 = arith.constant 0 : index
    %10 = vector.load %arg4[%c0_6, %c0_7] : memref<128x128xbf16, #tpu.memory_space<vmem>>, vector<128x128xbf16>
    %cst_8 = arith.constant dense<0.000000e+00> : vector<16x128xf32>
    %11 = tpu.matmul %9, %10, %cst_8 {dimension_numbers = #tpu.dot_dimension_numbers<[1], [0], [0], [1], [0, 0, 1, 1], [], []>} : vector<16x128xbf16>, vector<128x128xbf16>, vector<16x128xf32> -> vector<16x128xf32>
    %c0_9 = arith.constant 0 : index
    %c0_10 = arith.constant 0 : index
    %12 = vector.load %arg5[%c0_9, %c0_10] : memref<1x128xf32, #tpu.memory_space<vmem>>, vector<1x128xf32>
    %13 = vector.broadcast %12 : vector<1x128xf32> to vector<16x128xf32>
    %14 = arith.addf %11, %13 : vector<16x128xf32>
    %15 = arith.addf %14, %0 : vector<16x128xf32>
    %cst_11 = arith.constant dense<0.000000e+00> : vector<16xf32>
    %16 = vector.multi_reduction <add>, %15, %cst_11 [1] : vector<16x128xf32> to vector<16xf32>
    %17 = vector.shape_cast %16 : vector<16xf32> to vector<16x1xf32>
    %18 = arith.mulf %15, %15 : vector<16x128xf32>
    %cst_12 = arith.constant dense<0.000000e+00> : vector<16xf32>
    %19 = vector.multi_reduction <add>, %18, %cst_12 [1] : vector<16x128xf32> to vector<16xf32>
    %20 = vector.shape_cast %19 : vector<16xf32> to vector<16x1xf32>
    %cst_13 = arith.constant 3.125000e-02 : f32
    %21 = vector.broadcast %cst_13 : f32 to vector<16x1xf32>
    %22 = arith.mulf %17, %21 : vector<16x1xf32>
    %cst_14 = arith.constant 3.200000e+01 : f32
    %23 = vector.broadcast %cst_14 : f32 to vector<16x1xf32>
    %24 = arith.mulf %23, %22 : vector<16x1xf32>
    %25 = arith.mulf %24, %22 : vector<16x1xf32>
    %26 = arith.subf %20, %25 : vector<16x1xf32>
    %cst_15 = arith.constant 0.0322580636 : f32
    %27 = vector.broadcast %cst_15 : f32 to vector<16x1xf32>
    %28 = arith.mulf %26, %27 : vector<16x1xf32>
    %cst_16 = arith.constant 0.000000e+00 : f32
    %29 = vector.broadcast %cst_16 : f32 to vector<16x1xf32>
    %30 = arith.maximumf %28, %29 : vector<16x1xf32>
    %31 = math.sqrt %30 : vector<16x1xf32>
    %cst_17 = arith.constant 9.99999997E-7 : f32
    %32 = vector.broadcast %cst_17 : f32 to vector<16x1xf32>
    %33 = arith.addf %31, %32 : vector<16x1xf32>
    %34 = tpu.reciprocal %33 {approx = true} : vector<16x1xf32> -> vector<16x1xf32>
    %c0_18 = arith.constant 0 : index
    %c0_19 = arith.constant 0 : index
    %35 = vector.load %arg6[%c0_18, %c0_19] : memref<1x128xf32, #tpu.memory_space<vmem>>, vector<1x128xf32>
    %36 = vector.broadcast %22 : vector<16x1xf32> to vector<16x128xf32>
    %37 = arith.subf %15, %36 : vector<16x128xf32>
    %38 = vector.broadcast %34 : vector<16x1xf32> to vector<16x128xf32>
    %39 = arith.mulf %37, %38 : vector<16x128xf32>
    %40 = vector.broadcast %35 : vector<1x128xf32> to vector<16x128xf32>
    %41 = arith.mulf %40, %39 : vector<16x128xf32>
    %c0_20 = arith.constant 0 : index
    %c0_21 = arith.constant 0 : index
    %42 = vector.load %arg7[%c0_20, %c0_21] : memref<1x128xf32, #tpu.memory_space<vmem>>, vector<1x128xf32>
    %43 = vector.broadcast %42 : vector<1x128xf32> to vector<16x128xf32>
    %44 = arith.addf %41, %43 : vector<16x128xf32>
    %c0_22 = arith.constant 0 : index
    %c0_23 = arith.constant 0 : index
    %45 = vector.load %arg8[%c0_22, %c0_23] : memref<16x128xf32, #tpu.memory_space<vmem>>, vector<16x128xf32>
    tpu.vector_store %arg8[%c0_22, %c0_23], %44 {strides = array<i32>} : memref<16x128xf32, #tpu.memory_space<vmem>>, vector<16x128xf32>,
    return
  }
  func.func @transform_0(%arg0: i32) -> (i32, i32) {
    %c0_i32 = arith.constant 0 : i32
    %c0_i32_0 = arith.constant 0 : i32
    return %arg0, %c0_i32 : i32, i32
  }
  func.func @transform_1(%arg0: i32) -> (i32, i32) {
    %c0_i32 = arith.constant 0 : i32
    %c0_i32_0 = arith.constant 0 : i32
    %c0_i32_1 = arith.constant 0 : i32
    return %c0_i32, %c0_i32_0 : i32, i32
  }
  func.func @transform_2(%arg0: i32) -> (i32, i32) {
    %c0_i32 = arith.constant 0 : i32
    %c0_i32_0 = arith.constant 0 : i32
    %c0_i32_1 = arith.constant 0 : i32
    return %c0_i32, %c0_i32_0 : i32, i32
  }
  func.func @transform_3(%arg0: i32) -> (i32, i32) {
    %c0_i32 = arith.constant 0 : i32
    %c0_i32_0 = arith.constant 0 : i32
    %c0_i32_1 = arith.constant 0 : i32
    return %c0_i32, %c0_i32_0 : i32, i32
  }
  func.func @transform_4(%arg0: i32) -> (i32, i32) {
    %c0_i32 = arith.constant 0 : i32
    %c0_i32_0 = arith.constant 0 : i32
    %c0_i32_1 = arith.constant 0 : i32
    return %c0_i32, %c0_i32_0 : i32, i32
  }
  func.func @transform_5(%arg0: i32) -> (i32, i32) {
    %c0_i32 = arith.constant 0 : i32
    %c0_i32_0 = arith.constant 0 : i32
    %c0_i32_1 = arith.constant 0 : i32
    return %c0_i32, %c0_i32_0 : i32, i32
  }
  func.func @transform_6(%arg0: i32) -> (i32, i32) {
    %c0_i32 = arith.constant 0 : i32
    %c0_i32_0 = arith.constant 0 : i32
    %c0_i32_1 = arith.constant 0 : i32
    return %c0_i32, %c0_i32_0 : i32, i32
  }
  func.func @transform_7(%arg0: i32) -> (i32, i32) {
    %c0_i32 = arith.constant 0 : i32
    %c0_i32_0 = arith.constant 0 : i32
    return %arg0, %c0_i32 : i32, i32
  }
}

</mosaic_0001>

<bundles_post_ra>
// kernel: tpu_custom_call.1
= control target key start
LH: loop header
LB: loop body
LE: loop exit
PB: predicated region body
PF: predicated region fallthrough
CT: control target
= control target key end

     0   :  { %s1338_s0 = inlined_call_operand.hbm [shape: f32[32,128], index: 0, kind: input, shape index: {}]   ;;  %s1339_s1 = inlined_call_operand.hbm [shape: bf16[128,128], index: 1, kind: input, shape index: {}]   ;;  %s1340_s2 = inlined_call_operand.vmem [shape: f32[1,128], index: 2, kind: input, shape index: {}]   ;;  %s1341_s3 = inlined_call_operand.hbm [shape: bf16[128,128], index: 3, kind: input, shape index: {}]   ;;  %s1342_s4 = inlined_call_operand.vmem [shape: f32[1,128], index: 4, kind: input, shape index: {}]   ;;  %s1343_s5 = inlined_call_operand.vmem [shape: f32[1,128], index: 5, kind: input, shape index: {}]   ;;  %s1344_s6 = inlined_call_operand.vmem [shape: f32[1,128], index: 6, kind: input, shape index: {}]   ;;  %s1345_s7 = inlined_call_operand.hbm [shape: f32[32,128], index: 7, kind: output, shape index: {}]  }
   0x1   :  { %1350 = sst [smem:[#allocation12_spill]] %s1339_s1 }
   0x2   :  { %12 = vsyncpa [#allocation3], 0 }
   0x3   :  { %14 = vsyncpa [#allocation3 + $0x1], 0 }
   0x4   :  { %15 = vsyncpa [#allocation6], 0 }
   0x5   :  { %16 = vsyncpa [#allocation4], 0 }
   0x6   :  { %18 = vsyncpa [#allocation4 + $0x1], 0  ;;  %s1130_s24 = smov 0   ;;  %s1132_s25 = smov 0  }
   0x7   :  { %s1134_s26 = smov 0   ;;  %s1136_s27 = smov 0  }
   0x8 LB: > { %s1151_s28 = sadd.s32 4294967295, %s1076_s27   ;;  %s731_s29 = sadd.s32 4294967294, %s1076_s27   ;;  %s1076_s27 = sphi %s1136_s27, %s1369_s27   ;;  %s1072_s26 = sphi %s1134_s26, %s1368_s26   ;;  %s1068_s25 = sphi %s1132_s25, %s1367_s25   ;;  %s1064_s24 = sphi %s1130_s24, %s1366_s24  }
   0x9   : > { %p44_p0 = scmp.ne.s32.totalorder %s1068_s25, %s1064_s24  ;;  %p1346_p1 = scmp.eq.s32.totalorder %s1151_s28, 0 }
   0xa   : > { %p200_p3 = scmp.eq.s32.totalorder %s731_s29, 1  ;;  %p732_p5 = scmp.ge.s32.totalorder %s1076_s27, 1 }
   0xb   : > { %p1160_p4 = por %p1346_p1, %p44_p0  ;;  %p207_p7 = scmp.lt.s32.totalorder %s1076_s27, 3 }
   0xc   : > { %p1165_p6 = por %p200_p3, %p44_p0  ;;  %s1078_s10 = smov [#allocation5]  }
   0xd   : > { %s1351_s30 = scalar_select %p1160_p4, 1, 0 }
   0xe   : > { %s1352_s8 = scalar_select %p1165_p6, 1, 0 }
   0xf   : > { %p1170_p8 = pnand %p732_p5, %p207_p7  ;;  %s219_s11 = sshll.u32 %s1078_s10, 4  ;;  %s220_s11 = int_to_ptr.vmem [resolvable:$true] %s219_s11 }
  0x10   : > { %s1079_s13 = smov [#allocation7]   ;;  %s939_s15 = scalar_lea.vmem %s220_s11, 1024 }
  0x11   : > { %s1353_s9 = scalar_select %p1170_p8, 1, 0 }
  0x12   : > { %p841_p9 = pneg %p1170_p8  ;;  %s235_s14 = sshll.u32 %s1079_s13, 4  ;;  %s236_s14 = int_to_ptr.vmem [resolvable:$true] %s235_s14 }
  0x13   : > { %p940_p13 = scmp.ne.s32.totalorder %s220_s11, %s939_s15  ;;  %p947_p5 = scmp.lt.s32.totalorder %s220_s11, %s220_s11 }
  0x14   : > { %p1179_p11 = pnand %p841_p9, %p1346_p1  ;;  %p948_p7 = scmp.lt.s32.totalorder %s939_s15, %s939_s15 }
  0x16   : > { %p930_p12 = pneg %p1179_p11  ;;  %p949_p10 = por %p948_p7, %p947_p5 }
  0x18   : > { %p942_p0 = pnand %p940_p13, %p930_p12 }
  0x1a   : > { %p943_p3 = pneg %p942_p0 }
  0x1c   : > { %p950_p9 = pnand %p949_p10, %p943_p3 }
  0x1e   : > { %953 = shalt.err (!%p950_p9)
}
  0x1f   : > { %s1080_s16 = smov 64   ;;  %s1081_s17 = smov 4  }
  0x20   : > { %s1355_s1 = sld [smem:[#allocation12_spill]]  ;;  %s965_s20 = scalar_lea.vmem %s236_s14, 1024 }
  0x21   : > { %p966_p1 = scmp.ne.s32.totalorder %s236_s14, %s965_s20  ;;  %p973_p2 = scmp.lt.s32.totalorder %s236_s14, %s236_s14 }
  0x22   : > { %p974_p6 = scmp.lt.s32.totalorder %s965_s20, %s965_s20 }
  0x23   : > { %p968_p13 = pnand %p966_p1, %p930_p12 }
  0x24   : > { %p975_p5 = por %p974_p6, %p973_p2 }
  0x25   : > { %p969_p0 = pneg %p968_p13 }
  0x26   : > { %844 = dma.hbm_to_vmem [thread:$0]  (!%p1179_p11), %s1355_s1, 1024, %s220_s11, [#allocation6], %s1080_s16, %s1080_s16, %s1081_s17  }
  0x27   : > { %p976_p10 = pnand %p975_p5, %p969_p0 }
  0x29   : > { %979 = shalt.err (!%p976_p10)
}
  0x2a   : > { %847 = dma.hbm_to_vmem [thread:$0]  (!%p1179_p11), %s1341_s3, 1024, %s236_s14, [#allocation6], %s1080_s16, %s1080_s16, %s1081_s17  }
  0x2b   : > { %s1202_s23 = sadd.s32 1, %s1076_s27   ;;  %s31_s29 = sadd.s32 1, %s1072_s26 }
  0x2c   : > { %s28_s10 = ssub.s32 %s1076_s27, %s1202_s23  ;;  %p38_p1 = scmp.ne.s32.totalorder %s1072_s26, %s1068_s25 }
  0x2d   : > { %p29_p2 = scmp.eq.s32.totalorder %s28_s10, 0  ;;  %p39_p6 = scmp.eq.s32.totalorder %s1076_s27, 0 }
  0x2e   : > { %p1356_p12 = scmp.eq.s32.totalorder %s1151_s28, 1  ;;  %p858_p7 = scmp.lt.s32.totalorder %s1076_s27, 2 }
  0x2f   : > { %s1218_s12 = scalar_select %p29_p2, %s1072_s26, %s31_s29  }
  0x30   : > { %p1212_p3 = por %p1356_p12, %p38_p1  ;;  %p40_p9 = por %p39_p6, %p38_p1 }
  0x31   : > { %s258_s13 = sand.u32 1, %s1072_s26   ;;  %s769_s14 = sshll.u32 %s1076_s27, 8 }
  0x32   : > { %s1357_s11 = scalar_select %p1212_p3, 1, 0 }
  0x33   : > { %s736_s15 = sshll.u32 %s258_s13, 4  ;;  %s1225_s18 = scalar_lea.hbm %s1338_s0, %s769_s14 }
  0x34   : > { %s262_s19 = scalar_lea.vmem [#allocation2], %s736_s15  ;;  %p1229_p11 = pnand %p858_p7, %p40_p9 }
  0x35   : > { %s269_s20 = sshll.u32 %s262_s19, 4  ;;  %s1233_s22 = scalar_lea.sflag [#allocation3], %s258_s13  ;;  %s1227_s20 = int_to_ptr.vmem [resolvable:$true] %s269_s20 }
  0x36   : > { %s980_s29 = scalar_lea.hbm %s1225_s18, 256  ;;  %p982_p0 = pneg %p1229_p11 }
  0x37   : > { %p981_p13 = scmp.ne.s32.totalorder %s1225_s18, %s980_s29  ;;  %s985_s15 = scalar_lea.hbm %s1338_s0, 512 }
  0x38   : > { %p986_p1 = scmp.lt.s32.totalorder %s1225_s18, %s1338_s0  ;;  %p987_p2 = scmp.lt.s32.totalorder %s985_s15, %s980_s29 }
  0x39   : > { %p983_p5 = pnand %p982_p0, %p981_p13 }
  0x3a   : > { %p988_p6 = por %p987_p2, %p986_p1 }
  0x3b   : > { %p984_p10 = pneg %p983_p5 }
  0x3d   : > { %p989_p12 = pnand %p988_p6, %p984_p10 }
  0x3f   : > { %992 = shalt.err (!%p989_p12)
}
  0x40   : > { %s993_s13 = scalar_lea.vmem %s1227_s20, 256  ;;  %s1082_s19 = smov [#allocation2]  }
  0x41   : > { %p994_p7 = scmp.ne.s32.totalorder %s1227_s20, %s993_s13  ;;  %s998_s1 = sshll.u32 %s1082_s19, 4  ;;  %s999_s1 = int_to_ptr.vmem [resolvable:$false] %s998_s1 }
  0x42   : > { %s1000_s10 = scalar_lea.vmem %s999_s1, 512  ;;  %p1001_p5 = scmp.lt.s32.totalorder %s1227_s20, %s999_s1 }
  0x43   : > { %p996_p9 = pnand %p994_p7, %p982_p0  ;;  %p1002_p3 = scmp.lt.s32.totalorder %s1000_s10, %s993_s13 }
  0x45   : > { %p997_p13 = pneg %p996_p9  ;;  %p1003_p4 = por %p1002_p3, %p1001_p5 }
  0x47   : > { %p1004_p8 = pnand %p1003_p4, %p997_p13 }
  0x49   : > { %1007 = shalt.err (!%p1004_p8)
}
  0x4a   : > { %s1083_s29 = smov 128   ;;  %s1084_s14 = smov 8  }
  0x4b   : > { %851 = dma.hbm_to_vmem [thread:$0]  (!%p1229_p11), %s1225_s18, 256, %s1227_s20, %s1233_s22, %s1083_s29, %s1083_s29, %s1084_s14  }
  0x4c   : > { %p1359_p0 = scmp.ne.s32.totalorder %s1353_s9, 0 }
  0x4d   : > { %s1257_s15 = sand.u32 (!%p1359_p0), 1, %s1068_s25   ;;  %p1360_p4 = scmp.ne.s32.totalorder (!%p1359_p0), %s1351_s30, 0 }
  0x4e   : > { %281 = sbr.rel (%p1359_p0) target bundleno = 729 (0x2d9), region = 48  ;;  %s740_s1 = sshll.u32 (!%p1359_p0), %s1257_s15, 4 }
  0x4f   : > { %s284_s16 = scalar_lea.sflag (!%p1359_p0), [#allocation3], %s1257_s15  ;;  %s1263_s17 = scalar_lea.vmem (!%p1359_p0), [#allocation2], %s740_s1 }
  0x53   : > { %1051 = dma.done.wait (%p1360_p4), %s284_s16, 256  }
  0x54   : > { %1053 = vsyncadd (%p1360_p4), %s284_s16, 4294967040  ;;  %p1361_p8 = scmp.eq.s32.totalorder %s1151_s28, 0 }
  0x56   : > { %1055 = dma.done.wait (%p1361_p8), [#allocation6], 2048   ;;  %p1362_p3 = pmov %p1361_p8 }
  0x57   : > { %v1085_v0 = vmov 0.0   ;;  %vm1086_vm0 = vmmov 0   ;;  %v904_v1 = vld [vmem:[#allocation5 + $0x38] sm:$0xff]   ;;  %v905_v2 = vld [vmem:[#allocation5 + $0x30] sm:$0xff]   ;;  %v906_v3 = vld [vmem:[#allocation5 + $0x28] sm:$0xff]   ;;  %s770_s10 = sshll.u32 %s1151_s28, 8 }
  0x58   : > { %1057 = vsyncadd (%p1362_p3), [#allocation6], 4294965248  ;;  %789 = vmatprep.subr.bf16.mxu0 %v1085_v0  ;;  %805 = vmatprep.mubr.msk.bf16.mxu0 %vm1086_vm0, %v1085_v0  ;;  %v912_v4 = vld [vmem:[#allocation7 + $0x38] sm:$0xff]   ;;  %v907_v5 = vld [vmem:[#allocation5 + $0x20] sm:$0xff]   ;;  %s325_s29 = scalar_lea.vmem [#allocation8], %s740_s1  ;;  %s1293_s30 = scalar_lea.hbm %s1345_s7, %s770_s10 }
  0x59   : > { %809 = vmatprep.subr.bf16.mxu1 %v1085_v0  ;;  %825 = vmatprep.mubr.msk.bf16.mxu1 %vm1086_vm0, %v1085_v0  ;;  %v913_v6 = vld [vmem:[#allocation7 + $0x30] sm:$0xff]   ;;  %v908_v7 = vld [vmem:[#allocation5 + $0x18] sm:$0xff]   ;;  %v914_v8 = vld [vmem:[#allocation7 + $0x28] sm:$0xff]   ;;  %s639_s14 = sshll.u32 %s325_s29, 4  ;;  %s626_s9 = scalar_lea.sflag [#allocation4], %s1257_s15  ;;  %s1295_s14 = int_to_ptr.vmem [resolvable:$true] %s639_s14 }
  0x5a   : > { %790 = vmatpush3.bf16.msra.mxu0 %v904_v1  ;;  %810 = vmatpush3.bf16.msra.mxu1 %v912_v4  ;;  %v909_v9 = vld [vmem:[#allocation5 + $0x10] sm:$0xff]   ;;  %v915_v10 = vld [vmem:[#allocation7 + $0x20] sm:$0xff]   ;;  %v910_v11 = vld [vmem:[#allocation5 + $0x8] sm:$0xff]   ;;  %s1008_s18 = scalar_lea.vmem %s1295_s14, 256  ;;  %p1363_p10 = scmp.ne.s32.totalorder %s1357_s11, 0 }
  0x5b   : > { %791 = vmatprep.subr.bf16.mxu0 %v1085_v0  ;;  %811 = vmatprep.subr.bf16.mxu1 %v1085_v0  ;;  %v916_v12 = vld [vmem:[#allocation7 + $0x18] sm:$0xff]   ;;  %v911_v13 = vld [vmem:[#allocation5] sm:$0xff]   ;;  %v917_v17 = vld [vmem:[#allocation7 + $0x10] sm:$0xff]   ;;  %p1009_p11 = scmp.ne.s32.totalorder %s1295_s14, %s1008_s18  ;;  %s1087_s28 = smov [#allocation8]  }
  0x5c   : > { %v329_v14 = vld [vmem:[%s1263_s17] sm:$0xff]  ;;  %v330_v15 = vld [vmem:[%s1263_s17 + $0x8] sm:$0xff]  ;;  %s1012_s1 = sshll.u32 %s1087_s28, 4  ;;  %s1013_s1 = int_to_ptr.vmem [resolvable:$false] %s1012_s1 }
  0x5d   : > { %v331_v16 = vpack.c.bf16 %v330_v15, %v329_v14  ;;  %v918_v18 = vld [vmem:[#allocation7 + $0x8] sm:$0xff]   ;;  %v919_v19 = vld [vmem:[#allocation7] sm:$0xff]   ;;  %p1010_p1 = pnand %p1009_p11, %p1363_p10  ;;  %s1014_s20 = scalar_lea.vmem %s1013_s1, 512 }
  0x5e   : > { %792 = vmatpush3.bf16.msra.mxu0 %v905_v2  ;;  %812 = vmatpush3.bf16.msra.mxu1 %v913_v6  ;;  %v744_v20 = vld [vmem:[%s1340_s2] ss:$0 sm:$0xff]  ;;  %p1015_p6 = scmp.lt.s32.totalorder %s1295_s14, %s1013_s1  ;;  %p1016_p12 = scmp.lt.s32.totalorder %s1014_s20, %s1008_s18 }
  0x5f   : > { %793 = vmatprep.subr.bf16.mxu0 %v1085_v0  ;;  %813 = vmatprep.subr.bf16.mxu1 %v1085_v0  ;;  %v753_v30 = vld [vmem:[%s1342_s4] ss:$0 sm:$0xff]  ;;  %p1011_p2 = pneg %p1010_p1 }
  0x60   : > { %p1017_p7 = por %p1016_p12, %p1015_p6 }
  0x62   : > { %794 = vmatpush3.bf16.msra.mxu0 %v906_v3  ;;  %814 = vmatpush3.bf16.msra.mxu1 %v914_v8  ;;  %p1018_p9 = pnand %p1017_p7, %p1011_p2 }
  0x63   : > { %795 = vmatprep.subr.bf16.mxu0 %v1085_v0  ;;  %815 = vmatprep.subr.bf16.mxu1 %v1085_v0 }
  0x66   : > { %796 = vmatpush3.bf16.msra.mxu0 %v907_v5  ;;  %816 = vmatpush3.bf16.msra.mxu1 %v915_v10 }
  0x67   : > { %797 = vmatprep.subr.bf16.mxu0 %v1085_v0  ;;  %817 = vmatprep.subr.bf16.mxu1 %v1085_v0 }
  0x6a   : > { %798 = vmatpush3.bf16.msra.mxu0 %v908_v7  ;;  %818 = vmatpush3.bf16.msra.mxu1 %v916_v12  ;;  %v762_v7 = vld [vmem:[%s1343_s5] ss:$0 sm:$0xff] }
  0x6b   : > { %799 = vmatprep.subr.bf16.mxu0 %v1085_v0  ;;  %819 = vmatprep.subr.bf16.mxu1 %v1085_v0 }
  0x6e   : > { %800 = vmatpush3.bf16.msra.mxu0 %v909_v9  ;;  %820 = vmatpush3.bf16.msra.mxu1 %v917_v17  ;;  %v763_v9 = vld [vmem:[%s1344_s6] ss:$0 sm:$0xff] }
  0x6f   : > { %801 = vmatprep.subr.bf16.mxu0 %v1085_v0  ;;  %821 = vmatprep.subr.bf16.mxu1 %v1085_v0 }
  0x72   : > { %802 = vmatpush3.bf16.msra.mxu0 %v910_v11  ;;  %822 = vmatpush3.bf16.msra.mxu1 %v918_v18 }
  0x73   : > { %803 = vmatprep.subr.bf16.mxu0 %v1085_v0  ;;  %823 = vmatprep.subr.bf16.mxu1 %v1085_v0 }
  0x76   : > { %804 = vmatpush3.bf16.msra.mxu0 %v911_v13  ;;  %824 = vmatpush3.bf16.msra.mxu1 %v919_v19 }
  0x79   : > { %806 = vmatmul.mubr.bf16.vlgmr.msra.gmra.mxu0 %v331_v16 }
 0x139   : > { %v437_v21 = vpop.f32.mrf.mxu0 }
 0x13a   : > { %v438_v23 = vadd.f32 %v744_v20, %v437_v21 }
 0x13b   : > { %v807_v22 = vpop.f32.mrf.mxu0 }
 0x13c   : > { %v444_v27 = vmax.f32 %v438_v23, 0.0 }
 0x13d   : > { %v440_v24 = vpop.f32.mrf.mxu0 }
 0x13e   : > { %v441_v25 = vadd.f32 %v744_v20, %v440_v24 }
 0x13f   : > { %v808_v26 = vpop.f32.mrf.mxu0 }
 0x140   : > { %v445_v28 = vmax.f32 %v441_v25, 0.0 }
 0x142   : > { %v446_v29 = vpack.c.bf16 %v445_v28, %v444_v27 }
 0x144   : > { %826 = vmatmul.mubr.bf16.vlgmr.msra.gmra.mxu1 %v446_v29 }
 0x204   : > { %v552_v31 = vpop.f32.mrf.mxu1 }
 0x205   : > { %v553_v32 = vadd.f32 %v753_v30, %v552_v31 }
 0x206   : > { %v827_v33 = vpop.f32.mrf.mxu1 }
 0x207   : > { %v559_v34 = vadd.f32 %v553_v32, %v329_v14 }
 0x208   : > { %v555_v35 = vpop.f32.mrf.mxu1 }
 0x209   : > { %v556_v36 = vadd.f32 %v753_v30, %v555_v35  ;;  %561 = vadd.xlane.f32.xlu0 %v559_v34  ;;  %v565_v37 = vmul.f32 %v559_v34, %v559_v34 }
 0x20a   : > { %v828_v38 = vpop.f32.mrf.mxu1 }
 0x20b   : > { %v560_v39 = vadd.f32 %v556_v36, %v330_v15  ;;  %567 = vadd.xlane.f32.xlu1 %v565_v37 }
 0x20d   : > { %563 = vadd.xlane.f32.xlu0 %v560_v39  ;;  %v566_v40 = vmul.f32 %v560_v39, %v560_v39 }
 0x20f   : > { %569 = vadd.xlane.f32.xlu1 %v566_v40 }
 0x292   : > { %v562_v41 = vpop.xlane.xlu0 %561 }
 0x293   : > { %v571_v42 = vmul.f32 0.03125, %v562_v41 }
 0x294   : > { %v568_v44 = vpop.xlane.xlu1 %567 }
 0x295   : > { %v573_v43 = vmul.f32 32.0, %v571_v42  ;;  %v602_v5 = vsub.f32 %v559_v34, %v571_v42 }
 0x296   : > { %v564_v45 = vpop.xlane.xlu0 %563 }
 0x297   : > { %v575_v46 = vmul.f32 %v573_v43, %v571_v42  ;;  %v572_v47 = vmul.f32 0.03125, %v564_v45 }
 0x298   : > { %v570_v52 = vpop.xlane.xlu1 %569 }
 0x299   : > { %v577_v48 = vsub.f32 %v568_v44, %v575_v46  ;;  %v574_v49 = vmul.f32 32.0, %v572_v47  ;;  %v603_v11 = vsub.f32 %v560_v39, %v572_v47 }
 0x29b   : > { %v579_v50 = vmul.f32 0.032258064, %v577_v48  ;;  %v576_v51 = vmul.f32 %v574_v49, %v572_v47 }
 0x29d   : > { %v581_v53 = vmax.f32 %v579_v50, 0.0  ;;  %v578_v54 = vsub.f32 %v570_v52, %v576_v51 }
 0x29f   : > { %920 = vrsqrt.f32 %v581_v53  ;;  %v580_v55 = vmul.f32 0.032258064, %v578_v54  ;;  %vm585_vm1 = vcmp.eq.f32.partialorder %v581_v53, inf  ;;  %v588_v59 = vand.u32 2147483648, %v581_v53 }
 0x2a0   : > { %vm587_vm2 = vcmp.eq.f32.partialorder %v581_v53, 0.0 }
 0x2a1   : > { %v582_v56 = vmax.f32 %v580_v55, 0.0 }
 0x2a3   : > { %922 = vrsqrt.f32 %v582_v56  ;;  %vm592_vm3 = vcmp.eq.f32.partialorder %v582_v56, inf  ;;  %v595_v1 = vand.u32 2147483648, %v582_v56  ;;  %vm594_vm4 = vcmp.eq.f32.partialorder %v582_v56, 0.0 }
 0x2ac   : > { %v921_v57 = vpop.eup %920 }
 0x2ad   : > { %v584_v58 = vmul.f32 %v921_v57, %v581_v53 }
 0x2af   : > { %v586_v60 = vsel %vm585_vm1, %v581_v53, %v584_v58 }
 0x2b0   : > { %v589_v61 = vsel %vm587_vm2, %v588_v59, %v586_v60  ;;  %v923_v62 = vpop.eup %922 }
 0x2b1   : > { %v597_v63 = vadd.f32 1e-06, %v589_v61  ;;  %v591_v0 = vmul.f32 %v923_v62, %v582_v56 }
 0x2b3   : > { %924 = vrcp.f32 %v597_v63  ;;  %v593_v2 = vsel %vm592_vm3, %v582_v56, %v591_v0 }
 0x2b4   : > { %v596_v3 = vsel %vm594_vm4, %v595_v1, %v593_v2 }
 0x2b5   : > { %v598_v4 = vadd.f32 1e-06, %v596_v3 }
 0x2b7   : > { %926 = vrcp.f32 %v598_v4 }
 0x2c0   : > { %v925_v6 = vpop.eup %924 }
 0x2c1   : > { %v604_v8 = vmul.f32 %v925_v6, %v602_v5 }
 0x2c3   : > { %v612_v10 = vmul.f32 %v762_v7, %v604_v8 }
 0x2c4   : > { %v927_v12 = vpop.eup %926 }
 0x2c5   : > { %v621_v13 = vadd.f32 %v763_v9, %v612_v10  ;;  %v605_v14 = vmul.f32 %v927_v12, %v603_v11 }
 0x2c7   : > { %623 = vst [vmem:[%s325_s29] sm:$0xff] %v621_v13  ;;  %v613_v15 = vmul.f32 %v762_v7, %v605_v14 }
 0x2c9   : > { %v622_v16 = vadd.f32 %v763_v9, %v613_v15 }
 0x2cb   : > { %624 = vst [vmem:[%s325_s29 + $0x8] sm:$0xff] %v622_v16 }
 0x2cc   : > { %1021 = shalt.err (!%p1018_p9)
}
 0x2cd   : > { %s1022_s21 = scalar_lea.hbm %s1293_s30, 256  ;;  %s1026_s19 = scalar_lea.hbm %s1345_s7, 512 }
 0x2ce   : > { %p1023_p13 = scmp.ne.s32.totalorder %s1293_s30, %s1022_s21  ;;  %p1027_p4 = scmp.lt.s32.totalorder %s1293_s30, %s1345_s7 }
 0x2cf   : > { %p1028_p8 = scmp.lt.s32.totalorder %s1026_s19, %s1022_s21 }
 0x2d0   : > { %p1024_p5 = pnand %p1023_p13, %p1363_p10 }
 0x2d1   : > { %p1029_p3 = por %p1028_p8, %p1027_p4 }
 0x2d2   : > { %p1025_p0 = pneg %p1024_p5 }
 0x2d4   : > { %p1030_p11 = pnand %p1029_p3, %p1025_p0 }
 0x2d6   : > { %1033 = shalt.err (!%p1030_p11)
}
 0x2d7   : > { %s1088_s16 = smov 128   ;;  %s1089_s17 = smov 8  }
 0x2d8   : > { %839 = dma.vmem_to_hbm [thread:$0]  (%p1363_p10), %s1295_s14, 256, %s1293_s30, %s626_s9, %s1088_s16, %s1088_s16, %s1089_s17  }
 0x2d9 PF: > { %s654_s18 = sand.u32 1, %s1064_s24   ;;  %p1364_p1 = scmp.ne.s32.totalorder %s1352_s8, 0 }
 0x2da   : > { %p1365_p2 = scmp.ge.s32.totalorder %s1076_s27, 2  ;;  %s655_s28 = scalar_lea.sflag [#allocation4], %s654_s18 }
 0x2dc   : > { %p853_p6 = pnand %p1365_p2, %p1364_p1 }
 0x2de   : > { %p854_p12 = pneg %p853_p6 }
 0x2e0   : > { %1059 = dma.done.wait (%p854_p12), %s655_s28, 256  }
 0x2e1   : > { %1061 = vsyncadd (%p854_p12), %s655_s28, 4294967040  ;;  %p21_p7 = scmp.ge.s32.totalorder %s1202_s23, 4   ;;  %s1366_s24 = smov %s1068_s25 }
 0x2e2   : > { %s1367_s25 = smov %s1072_s26  ;;  %s1368_s26 = smov %s1218_s12 }
 0x2e3   : > { %s1369_s27 = smov %s1202_s23  ;;  %23 = sbr.rel (!%p21_p7) target bundleno = 8 (0x8), region = 101 }
 0x2e8   :  { %660 = vsyncpa [#allocation3], 1 }
 0x2e9   :  { %662 = vsyncpa [#allocation3 + $0x1], 1 }
 0x2ea   :  { %663 = vsyncpa [#allocation6], 1 }
 0x2eb   :  { %664 = vsyncpa [#allocation4], 1 }
 0x2ec   :  { %666 = vsyncpa [#allocation4 + $0x1], 1 }

</bundles_post_ra>
